<compile_context>
chip_gen: v5e
topology: v5e:2x2
jax: 0.10.0
libtpu: 0.0.40
codegen_flags: <defaults>
</compile_context>

<pallas_src>
import jax
import jax.numpy as jnp
from jax.experimental import pallas as pl
from jax.experimental.pallas import tpu as pltpu

EPS = 1e-5  # PyTorch nn.LayerNorm default eps


def _round_up(v, m):
    return ((v + m - 1) // m) * m


def _make_addnorm_kernel(d_true, d_pad):
    """Kernel specialized on (true D, padded D). Stats are masked if padded."""
    need_mask = d_pad != d_true
    inv_d = 1.0 / float(d_true)

    def kernel(x_ref, y_ref, g_ref, b_ref, o_ref):
        # x_ref, y_ref, o_ref: (row_tile, d_pad); g_ref, b_ref: (1, d_pad).
        y = y_ref[...].astype(jnp.float32)
        if need_mask:
            lane = jax.lax.broadcasted_iota(jnp.int32, y.shape, dimension=1)
            valid = lane < d_true
            y = jnp.where(valid, y, 0.0)
        mean = jnp.sum(y, axis=-1, keepdims=True) * inv_d
        centered = y - mean
        if need_mask:
            centered = jnp.where(valid, centered, 0.0)
        var = jnp.sum(centered * centered, axis=-1, keepdims=True) * inv_d
        y_norm = centered * jax.lax.rsqrt(var + EPS)
        gamma = g_ref[...].astype(jnp.float32)  # (1, d_pad) broadcasts over rows
        beta = b_ref[...].astype(jnp.float32)
        out = x_ref[...].astype(jnp.float32) + y_norm * gamma + beta
        o_ref[...] = out.astype(o_ref.dtype)

    return kernel


def add_norm(x, y, gamma, beta, *, row_tile=None, target_tile_bytes=2 << 20):
    """x, y: (..., D); gamma, beta: (D,). Returns x + LayerNorm(y)."""
    assert x.shape == y.shape
    orig_shape = x.shape
    D = orig_shape[-1]
    rows = 1
    for s in orig_shape[:-1]:
        rows *= s

    itemsize = jnp.dtype(x.dtype).itemsize
    sublane = max(8, 32 // itemsize)      # 8 for f32, 16 for bf16/f16
    D_pad = _round_up(D, 128)             # lane-dense last dim (unmasked stores)

    # Auto row-tile: target ~2 MiB per input tile (HBM-bandwidth bound; big
    # tiles amortize per-step overhead), multiple of the sublane packing.
    if row_tile is None:
        max_rows = max(target_tile_bytes // (D_pad * itemsize), sublane)
        row_tile = (max_rows // sublane) * sublane
    row_tile = max(sublane, (row_tile // sublane) * sublane)
    row_tile = min(row_tile, _round_up(rows, sublane))

    rows_pad = _round_up(rows, row_tile)

    x2 = x.reshape(rows, D)
    y2 = y.reshape(rows, D)
    if rows_pad != rows or D_pad != D:
        x2 = jnp.pad(x2, ((0, rows_pad - rows), (0, D_pad - D)))
        y2 = jnp.pad(y2, ((0, rows_pad - rows), (0, D_pad - D)))
    g2 = gamma.reshape(1, D)
    b2 = beta.reshape(1, D)
    if D_pad != D:
        g2 = jnp.pad(g2, ((0, 0), (0, D_pad - D)))
        b2 = jnp.pad(b2, ((0, 0), (0, D_pad - D)))

    grid = (rows_pad // row_tile,)

    # VMEM budget: 2 inputs + 1 output, double-buffered, plus params/headroom.
    tile_bytes = row_tile * D_pad * itemsize
    vmem_bytes = int(2 * 3 * tile_bytes * 1.25) + (4 << 20)
    vmem_bytes = min(max(vmem_bytes, 32 << 20), 48 << 20)  # fits v7x's 64 MiB

    kernel = _make_addnorm_kernel(D, D_pad)

    out2 = pl.pallas_call(
        kernel,
        out_shape=jax.ShapeDtypeStruct((rows_pad, D_pad), x.dtype),
        grid_spec=pltpu.PrefetchScalarGridSpec(
            num_scalar_prefetch=0,
            grid=grid,
            in_specs=[
                pl.BlockSpec((row_tile, D_pad), lambda i: (i, 0)),  # x tile
                pl.BlockSpec((row_tile, D_pad), lambda i: (i, 0)),  # y tile
                pl.BlockSpec((1, D_pad), lambda i: (0, 0)),          # gamma
                pl.BlockSpec((1, D_pad), lambda i: (0, 0)),          # beta
            ],
            out_specs=pl.BlockSpec((row_tile, D_pad), lambda i: (i, 0)),
        ),
        compiler_params=pltpu.CompilerParams(
            dimension_semantics=("parallel",),   # shards across v7x's 2 TCs
            vmem_limit_bytes=vmem_bytes,
        ),
    )(x2, y2, g2, b2)

    if rows_pad != rows or D_pad != D:
        out2 = out2[:rows, :D]
    return out2.reshape(orig_shape)


def add_norm_ref(x, y, gamma, beta):
    y32 = y.astype(jnp.float32)
    mean = jnp.mean(y32, axis=-1, keepdims=True)
    var = jnp.mean((y32 - mean) ** 2, axis=-1, keepdims=True)
    y_norm = (y32 - mean) * jax.lax.rsqrt(var + EPS)
    return (x.astype(jnp.float32) + y_norm * gamma + beta).astype(x.dtype)


if __name__ == "__main__":
    key = jax.random.PRNGKey(0)

    # Test 1: small module-consistent shape; D=32 exercises the D-padding /
    # masked-stats path (output is still written lane-dense at D_pad=128).
    B, S, D = 2, 8, 32
    k1, k2, k3, k4, key = jax.random.split(key, 5)
    x = jax.random.normal(k1, (B, S, D), dtype=jnp.float32)
    y = jax.random.normal(k2, (B, S, D), dtype=jnp.float32)
    gamma = 1.0 + 0.1 * jax.random.normal(k3, (D,), dtype=jnp.float32)
    beta = 0.1 * jax.random.normal(k4, (D,), dtype=jnp.float32)

    out = add_norm(x, y, gamma, beta)
    jax.block_until_ready(out)
    ref = add_norm_ref(x, y, gamma, beta)
    assert jnp.allclose(out, ref, atol=1e-5, rtol=1e-5), "mismatch (test 1)"

    # Test 2: lane-dense D=128, rows not a multiple of the sublane count
    # (exercises row padding / no-mask fast path).
    B2, S2, D2 = 3, 5, 128
    k1, k2, k3, k4, key = jax.random.split(key, 5)
    x2 = jax.random.normal(k1, (B2, S2, D2), dtype=jnp.float32)
    y2 = jax.random.normal(k2, (B2, S2, D2), dtype=jnp.float32)
    gamma2 = 1.0 + 0.1 * jax.random.normal(k3, (D2,), dtype=jnp.float32)
    beta2 = 0.1 * jax.random.normal(k4, (D2,), dtype=jnp.float32)

    out2 = add_norm(x2, y2, gamma2, beta2)
    jax.block_until_ready(out2)
    ref2 = add_norm_ref(x2, y2, gamma2, beta2)
    assert jnp.allclose(out2, ref2, atol=1e-5, rtol=1e-5), "mismatch (test 2)"

    print("KERNEL_OK")
</pallas_src>

<mosaic_0001>
module attributes {stable_mosaic.version = 11 : i64} {
  func.func @kernel(%arg0: i32, %arg1: memref<16x128xf32, #tpu.memory_space<vmem>>, %arg2: memref<16x128xf32, #tpu.memory_space<vmem>>, %arg3: memref<1x128xf32, #tpu.memory_space<vmem>>, %arg4: memref<1x128xf32, #tpu.memory_space<vmem>>, %arg5: memref<16x128xf32, #tpu.memory_space<vmem>>) attributes {dimension_semantics = [#tpu.dimension_semantics<parallel>], iteration_bounds = array<i64: 1>, scalar_prefetch = 0 : i64, scratch_operands = 0 : i64, tpu.core_type = #tpu.core_type<tc>, window_params = [{transform_indices = @transform_0, window_bounds = array<i64: 16, 128>}, {transform_indices = @transform_1, window_bounds = array<i64: 16, 128>}, {pipeline_mode = #tpu.pipeline_mode<synchronous>, transform_indices = @transform_2, window_bounds = array<i64: 1, 128>}, {pipeline_mode = #tpu.pipeline_mode<synchronous>, transform_indices = @transform_3, window_bounds = array<i64: 1, 128>}, {transform_indices = @transform_4, window_bounds = array<i64: 16, 128>}]} {
    %c0 = arith.constant 0 : index
    %c0_0 = arith.constant 0 : index
    %0 = vector.load %arg2[%c0, %c0_0] : memref<16x128xf32, #tpu.memory_space<vmem>>, vector<16x128xf32>
    %1 = tpu.iota {dimensions = array<i32: 1>} : vector<16x128xi32>
    %c32_i32 = arith.constant 32 : i32
    %2 = vector.broadcast %c32_i32 : i32 to vector<16x128xi32>
    %3 = arith.cmpi slt, %1, %2 : vector<16x128xi32>
    %cst = arith.constant 0.000000e+00 : f32
    %4 = vector.broadcast %cst : f32 to vector<16x128xf32>
    %5 = arith.select %3, %0, %4 : vector<16x128xi1>, vector<16x128xf32>
    %cst_1 = arith.constant dense<0.000000e+00> : vector<16xf32>
    %6 = vector.multi_reduction <add>, %5, %cst_1 [1] : vector<16x128xf32> to vector<16xf32>
    %7 = vector.shape_cast %6 : vector<16xf32> to vector<16x1xf32>
    %cst_2 = arith.constant 3.125000e-02 : f32
    %8 = vector.broadcast %cst_2 : f32 to vector<16x1xf32>
    %9 = arith.mulf %7, %8 : vector<16x1xf32>
    %10 = vector.broadcast %9 : vector<16x1xf32> to vector<16x128xf32>
    %11 = arith.subf %5, %10 : vector<16x128xf32>
    %cst_3 = arith.constant 0.000000e+00 : f32
    %12 = vector.broadcast %cst_3 : f32 to vector<16x128xf32>
    %13 = arith.select %3, %11, %12 : vector<16x128xi1>, vector<16x128xf32>
    %14 = arith.mulf %13, %13 : vector<16x128xf32>
    %cst_4 = arith.constant dense<0.000000e+00> : vector<16xf32>
    %15 = vector.multi_reduction <add>, %14, %cst_4 [1] : vector<16x128xf32> to vector<16xf32>
    %16 = vector.shape_cast %15 : vector<16xf32> to vector<16x1xf32>
    %cst_5 = arith.constant 3.125000e-02 : f32
    %17 = vector.broadcast %cst_5 : f32 to vector<16x1xf32>
    %18 = arith.mulf %16, %17 : vector<16x1xf32>
    %cst_6 = arith.constant 9.99999974E-6 : f32
    %19 = vector.broadcast %cst_6 : f32 to vector<16x1xf32>
    %20 = arith.addf %18, %19 : vector<16x1xf32>
    %21 = math.rsqrt %20 : vector<16x1xf32>
    %22 = vector.broadcast %21 : vector<16x1xf32> to vector<16x128xf32>
    %23 = arith.mulf %13, %22 : vector<16x128xf32>
    %c0_7 = arith.constant 0 : index
    %c0_8 = arith.constant 0 : index
    %24 = vector.load %arg3[%c0_7, %c0_8] : memref<1x128xf32, #tpu.memory_space<vmem>>, vector<1x128xf32>
    %c0_9 = arith.constant 0 : index
    %c0_10 = arith.constant 0 : index
    %25 = vector.load %arg4[%c0_9, %c0_10] : memref<1x128xf32, #tpu.memory_space<vmem>>, vector<1x128xf32>
    %c0_11 = arith.constant 0 : index
    %c0_12 = arith.constant 0 : index
    %26 = vector.load %arg1[%c0_11, %c0_12] : memref<16x128xf32, #tpu.memory_space<vmem>>, vector<16x128xf32>
    %27 = vector.broadcast %24 : vector<1x128xf32> to vector<16x128xf32>
    %28 = arith.mulf %23, %27 : vector<16x128xf32>
    %29 = arith.addf %26, %28 : vector<16x128xf32>
    %30 = vector.broadcast %25 : vector<1x128xf32> to vector<16x128xf32>
    %31 = arith.addf %29, %30 : vector<16x128xf32>
    %c0_13 = arith.constant 0 : index
    %c0_14 = arith.constant 0 : index
    %32 = vector.load %arg5[%c0_13, %c0_14] : memref<16x128xf32, #tpu.memory_space<vmem>>, vector<16x128xf32>
    tpu.vector_store %arg5[%c0_13, %c0_14], %31 {strides = array<i32>} : memref<16x128xf32, #tpu.memory_space<vmem>>, vector<16x128xf32>,
    return
  }
  func.func @transform_0(%arg0: i32) -> (i32, i32) {
    %c0_i32 = arith.constant 0 : i32
    %c0_i32_0 = arith.constant 0 : i32
    return %arg0, %c0_i32 : i32, i32
  }
  func.func @transform_1(%arg0: i32) -> (i32, i32) {
    %c0_i32 = arith.constant 0 : i32
    %c0_i32_0 = arith.constant 0 : i32
    return %arg0, %c0_i32 : i32, i32
  }
  func.func @transform_2(%arg0: i32) -> (i32, i32) {
    %c0_i32 = arith.constant 0 : i32
    %c0_i32_0 = arith.constant 0 : i32
    %c0_i32_1 = arith.constant 0 : i32
    return %c0_i32, %c0_i32_0 : i32, i32
  }
  func.func @transform_3(%arg0: i32) -> (i32, i32) {
    %c0_i32 = arith.constant 0 : i32
    %c0_i32_0 = arith.constant 0 : i32
    %c0_i32_1 = arith.constant 0 : i32
    return %c0_i32, %c0_i32_0 : i32, i32
  }
  func.func @transform_4(%arg0: i32) -> (i32, i32) {
    %c0_i32 = arith.constant 0 : i32
    %c0_i32_0 = arith.constant 0 : i32
    return %arg0, %c0_i32 : i32, i32
  }
}

</mosaic_0001>

<bundles_post_ra>
// kernel: tpu_custom_call.1
= control target key start
LH: loop header
LB: loop body
LE: loop exit
PB: predicated region body
PF: predicated region fallthrough
CT: control target
= control target key end

     0   :  { %9 = vsyncpa [#allocation3], 0  ;;  %s284_s0 = inlined_call_operand.hbm [shape: f32[16,128], index: 0, kind: input, shape index: {}]   ;;  %s285_s1 = inlined_call_operand.hbm [shape: f32[16,128], index: 1, kind: input, shape index: {}]   ;;  %s286_s2 = inlined_call_operand.vmem [shape: f32[1,128], index: 2, kind: input, shape index: {}]   ;;  %s287_s3 = inlined_call_operand.vmem [shape: f32[1,128], index: 3, kind: input, shape index: {}]   ;;  %s288_s4 = inlined_call_operand.hbm [shape: f32[16,128], index: 4, kind: output, shape index: {}]  }
   0x1   :  { %10 = vsyncpa [#allocation6], 0 }
   0x2   :  { %11 = vsyncpa [#allocation4], 0  ;;  %s16_s17 = sshll.u32 %s284_s0, 4  ;;  %s226_s18 = smov [#allocation2]   ;;  %s17_s17 = int_to_ptr.hbm [resolvable:$true] %s16_s17 }
   0x3   :  { %s18_s19 = sshll.u32 %s226_s18, 4  ;;  %s29_s22 = sshll.u32 %s285_s1, 4  ;;  %s19_s19 = int_to_ptr.vmem [resolvable:$true] %s18_s19  ;;  %s30_s22 = int_to_ptr.hbm [resolvable:$true] %s29_s22 }
   0x4   :  { %s227_s23 = smov 128   ;;  %s228_s24 = smov 8  }
   0x5   :  { %24 = dma.hbm_to_vmem [thread:$0]  %s17_s17, 256, %s19_s19, [#allocation3], %s227_s23, %s227_s23, %s228_s24  }
   0x6   :  { %s229_s25 = smov [#allocation5]  }
   0x7   :  { %s31_s26 = sshll.u32 %s229_s25, 4  ;;  %s32_s26 = int_to_ptr.vmem [resolvable:$true] %s31_s26 }
   0x8   :  { %37 = dma.hbm_to_vmem [thread:$0]  %s30_s22, 256, %s32_s26, [#allocation6], %s227_s23, %s227_s23, %s228_s24  }
   0x9   :  { %220 = dma.done.wait [#allocation3], 256  }
   0xa   :  { %221 = vsyncadd [#allocation3], 4294967040 }
   0xb   :  { %222 = dma.done.wait [#allocation6], 256  }
   0xc   :  { %223 = vsyncadd [#allocation6], 4294967040  ;;  %v52_v0 = vlaneseq  ;;  %v50_v2 = vld [vmem:[#allocation5] sm:$0xff]  ;;  %v51_v4 = vld [vmem:[#allocation5 + $0x8] sm:$0xff]  ;;  %s123_s6 = sshll.u32 %s288_s4, 4  ;;  %s124_s6 = int_to_ptr.hbm [resolvable:$true] %s123_s6 }
   0xd   :  { %v142_v30 = vld [vmem:[%s286_s2] ss:$0 sm:$0xff]  ;;  %v102_v44 = vld [vmem:[#allocation2 + $0x8] sm:$0xff]  ;;  %s230_s2 = smov [#allocation7]  }
   0xe   :  { %v53_v1 = vand.u32 127, %v52_v0  ;;  %v101_v35 = vld [vmem:[#allocation2] sm:$0xff]  ;;  %s121_s29 = sshll.u32 %s230_s2, 4  ;;  %s122_s29 = int_to_ptr.vmem [resolvable:$true] %s121_s29 }
   0xf   :  { %v143_v37 = vld [vmem:[%s287_s3] ss:$0 sm:$0xff] }
  0x10   :  { %vm54_vm0 = vcmp.lt.s32.totalorder %v53_v1, 32 }
  0x11   :  { %v55_v3 = vsel %vm54_vm0, %v50_v2, 0.0  ;;  %v56_v5 = vsel %vm54_vm0, %v51_v4, 0.0 }
  0x12   :  { %57 = vadd.xlane.f32.xlu0 %v55_v3 }
  0x1a   :  { %59 = vadd.xlane.f32.xlu0 %v56_v5 }
  0x85   :  { %v58_v6 = vpop.xlane.xlu0 %57 }
  0x86   :  { %v61_v7 = vmul.f32 0.03125, %v58_v6 }
  0x88   :  { %v63_v8 = vsub.f32 %v55_v3, %v61_v7 }
  0x8a   :  { %v65_v9 = vsel %vm54_vm0, %v63_v8, 0.0 }
  0x8b   :  { %v67_v10 = vmul.f32 %v65_v9, %v65_v9 }
  0x8d   :  { %69 = vadd.xlane.f32.xlu1 %v67_v10  ;;  %v60_v11 = vpop.xlane.xlu0 %59 }
  0x8e   :  { %v62_v12 = vmul.f32 0.03125, %v60_v11 }
  0x90   :  { %v64_v13 = vsub.f32 %v56_v5, %v62_v12 }
  0x92   :  { %v66_v14 = vsel %vm54_vm0, %v64_v13, 0.0 }
  0x93   :  { %v68_v15 = vmul.f32 %v66_v14, %v66_v14 }
  0x95   :  { %71 = vadd.xlane.f32.xlu1 %v68_v15 }
 0x100   :  { %v70_v16 = vpop.xlane.xlu1 %69 }
 0x101   :  { %v73_v17 = vmul.f32 0.03125, %v70_v16 }
 0x103   :  { %v75_v18 = vadd.f32 1e-05, %v73_v17 }
 0x105   :  { %144 = vrsqrt.f32 %v75_v18  ;;  %vm83_vm2 = vweird.f32 %v75_v18 }
 0x108   :  { %v72_v19 = vpop.xlane.xlu1 %71 }
 0x109   :  { %v74_v20 = vmul.f32 0.03125, %v72_v19 }
 0x10b   :  { %v145_v21 = vpop.eup %144  ;;  %v76_v22 = vadd.f32 1e-05, %v74_v20 }
 0x10c   :  { %v78_v23 = vmul.f32 %v145_v21, %v75_v18  ;;  %vm84_vm1 = vweird.f32 %v145_v21 }
 0x10d   :  { %146 = vrsqrt.f32 %v76_v22  ;;  %vm85_vm3 = vmor %vm83_vm2, %vm84_vm1  ;;  %vm93_vm5 = vweird.f32 %v76_v22 }
 0x10e   :  { %v79_v24 = vmul.f32 %v145_v21, %v78_v23 }
 0x110   :  { %v80_v25 = vmul.f32 0.5, %v79_v24 }
 0x112   :  { %v81_v26 = vsub.f32 1.5, %v80_v25 }
 0x113   :  { %v147_v27 = vpop.eup %146 }
 0x114   :  { %v82_v28 = vmul.f32 %v145_v21, %v81_v26  ;;  %v88_v29 = vmul.f32 %v147_v27, %v76_v22  ;;  %vm94_vm4 = vweird.f32 %v147_v27 }
 0x115   :  { %vm95_vm6 = vmor %vm93_vm5, %vm94_vm4 }
 0x116   :  { %v86_v31 = vsel %vm85_vm3, %v145_v21, %v82_v28  ;;  %v89_v32 = vmul.f32 %v147_v27, %v88_v29 }
 0x117   :  { %v97_v33 = vmul.f32 %v86_v31, %v65_v9 }
 0x118   :  { %v90_v34 = vmul.f32 0.5, %v89_v32 }
 0x119   :  { %v106_v36 = vmul.f32 %v142_v30, %v97_v33 }
 0x11a   :  { %v91_v38 = vsub.f32 1.5, %v90_v34 }
 0x11b   :  { %v108_v39 = vadd.f32 %v106_v36, %v101_v35 }
 0x11c   :  { %v92_v40 = vmul.f32 %v147_v27, %v91_v38 }
 0x11d   :  { %v113_v41 = vadd.f32 %v143_v37, %v108_v39 }
 0x11e   :  { %v96_v42 = vsel %vm95_vm6, %v147_v27, %v92_v40 }
 0x11f   :  { %v98_v43 = vmul.f32 %v96_v42, %v66_v14  ;;  %115 = vst [vmem:[#allocation7] sm:$0xff] %v113_v41 }
 0x121   :  { %v107_v45 = vmul.f32 %v142_v30, %v98_v43 }
 0x123   :  { %v109_v46 = vadd.f32 %v107_v45, %v102_v44 }
 0x125   :  { %v114_v47 = vadd.f32 %v143_v37, %v109_v46 }
 0x127   :  { %116 = vst [vmem:[#allocation7 + $0x8] sm:$0xff] %v114_v47 }
 0x128   :  { %129 = dma.vmem_to_hbm [thread:$0]  %s122_s29, 256, %s124_s6, [#allocation4], %s227_s23, %s227_s23, %s228_s24  }
 0x129   :  { %224 = dma.done.wait [#allocation4], 256  }
 0x12a   :  { %225 = vsyncadd [#allocation4], 4294967040 }
 0x12b   :  { %134 = vsyncpa [#allocation3], 1 }
 0x12c   :  { %135 = vsyncpa [#allocation6], 1 }
 0x12d   :  { %136 = vsyncpa [#allocation4], 1 }

</bundles_post_ra>
